<compile_context>
chip_gen: v6e
topology: v6e:2x2x1
jax: 0.10.0
libtpu: 0.0.40
codegen_flags: <defaults>
</compile_context>

<pallas_src>
import math

import jax
import jax.numpy as jnp
from jax.experimental import pallas as pl
from jax.experimental.pallas import tpu as pltpu


def build_positional_encoding(d_model: int, max_len: int = 5000) -> jnp.ndarray:
    """Deterministic PE buffer, identical math to the torch __init__.

    Returned shape is (max_len, d_model) in float32; the torch module stores the
    same values as (max_len, 1, d_model) -- the batch axis is re-introduced by
    broadcasting inside the kernel. (Like the original module, assumes even d_model.)
    """
    position = jnp.arange(max_len, dtype=jnp.float32)[:, None]                  # (L, 1)
    div_term = jnp.exp(
        jnp.arange(0, d_model, 2, dtype=jnp.float32) * (-math.log(10000.0) / d_model)
    )                                                                            # (D/2,)
    angles = position * div_term                                                 # (L, D/2)
    pe = jnp.zeros((max_len, d_model), dtype=jnp.float32)
    pe = pe.at[:, 0::2].set(jnp.sin(angles))
    pe = pe.at[:, 1::2].set(jnp.cos(angles))
    return pe


def _pe_add_kernel(x_ref, pe_ref, o_ref):
    # x_ref / o_ref: (TS, B, D); pe_ref: (TS, D) (f32 in HBM).
    # Do the add in f32 (parity with torch, which keeps pe in f32) and cast the
    # result to the output dtype. All VPU work; free under the HBM roofline.
    x = x_ref[...].astype(jnp.float32)
    pe = pe_ref[...].astype(jnp.float32)
    o_ref[...] = (x + pe[:, None, :]).astype(o_ref.dtype)


def _choose_seq_tile(S: int, B: int, D: int, itemsize: int,
                     target_block_bytes: int) -> int:
    """Pick TS (multiple of 8, >= 8, <= S) for (TS, B, D) full-batch blocks."""
    bytes_per_seq_row = max(1, B * D * itemsize)
    ts = target_block_bytes // bytes_per_seq_row
    ts = max(8, min(ts, S))
    ts = max(8, (ts // 8) * 8)                       # dense sublanes for the pe block
    # Megacore: guarantee >=2 programs along the parallel seq axis when possible,
    # so both v7x TensorCores get work (neutral on single-core v5e/v6e).
    if ts >= S and S >= 16:
        half = (S + 1) // 2
        ts = max(8, (half // 8) * 8)
    # Prefer a divisor of S near ts: avoids a ragged final block (padded loads /
    # masked partial stores).
    if S % ts != 0:
        for cand in range(ts, 7, -8):
            if S % cand == 0:
                ts = cand
                break
    return min(ts, S)


def positional_encoding_forward(
    x: jnp.ndarray,
    pe: jnp.ndarray,
    *,
    target_block_bytes: int = 4 << 20,
    min_pallas_bytes: int = 2 << 20,
    donate_x: bool = False,
) -> jnp.ndarray:
    """x: (S, B, D); pe: (max_len, D) with max_len >= S. Returns x + pe[:S] broadcast over B."""
    S, B, D = x.shape
    if pe.ndim != 2 or pe.shape[1] != D or pe.shape[0] < S:
        raise ValueError(f"pe must have shape (max_len>={S}, {D}); got {pe.shape}")

    def _xla_path():
        # Small / degenerate shapes: let XLA fuse the (f32) add into neighbors.
        return (x.astype(jnp.float32) + pe[:S].astype(jnp.float32)[:, None, :]).astype(x.dtype)

    # S < 8 would make the pe block's sublane dim illegal; tiny inputs are pure
    # launch overhead for a standalone pallas_call -- both take the XLA path.
    if S < 8 or x.size * x.dtype.itemsize < min_pallas_bytes:
        return _xla_path()

    TS = _choose_seq_tile(S, B, D, x.dtype.itemsize, target_block_bytes)
    grid = (pl.cdiv(S, TS),)

    # Raise the scoped-VMEM limit to cover the actual double-buffered footprint
    # (x block + out block + pe block), with headroom; capped well under v7x's
    # 64 MiB physical VMEM.
    x_block_bytes = TS * B * D * x.dtype.itemsize
    pe_block_bytes = TS * D * pe.dtype.itemsize
    vmem_limit = 2 * (2 * x_block_bytes + pe_block_bytes) + (8 << 20)
    vmem_limit = int(min(max(vmem_limit, 32 << 20), 48 << 20))

    return pl.pallas_call(
        _pe_add_kernel,
        out_shape=jax.ShapeDtypeStruct((S, B, D), x.dtype),
        grid_spec=pltpu.PrefetchScalarGridSpec(
            num_scalar_prefetch=0,
            grid=grid,
            in_specs=[
                # x block: full batch + full d_model -> one contiguous HBM run per DMA.
                pl.BlockSpec((TS, B, D), lambda s: (s, 0, 0)),
                # pe block: sliced from the full (max_len, D) f32 buffer purely via
                # the index_map (no wrapper slice/cast/copy).
                pl.BlockSpec((TS, D), lambda s: (s, 0)),
            ],
            out_specs=pl.BlockSpec((TS, B, D), lambda s: (s, 0, 0)),
        ),
        compiler_params=pltpu.CompilerParams(
            dimension_semantics=("parallel",),
            vmem_limit_bytes=vmem_limit,
        ),
        input_output_aliases={0: 0} if donate_x else {},
    )(x, pe)


if __name__ == "__main__":
    key = jax.random.PRNGKey(0)
    kx, kt = jax.random.split(key)

    # Small but representative transformer shape (sequence-first, like the module):
    # d_model a multiple of 128 (lane-dense), full batch on the sublane axis.
    seq_len, batch, d_model, max_len = 64, 8, 128, 256
    x = jax.random.normal(kx, (seq_len, batch, d_model), dtype=jnp.float32)
    pe = build_positional_encoding(d_model, max_len=max_len)

    # Force the Pallas path for this (deliberately small) test shape; auto tiling
    # then yields TS=32 -> grid=(2,), exercising pipelining and the parallel seq axis.
    out = positional_encoding_forward(x, pe, min_pallas_bytes=0)
    out = jax.block_until_ready(out)

    ref = x + pe[:seq_len][:, None, :]
    assert out.shape == (seq_len, batch, d_model)
    assert jnp.allclose(out, ref, atol=1e-6, rtol=1e-6)

    # bf16 input: pe stays f32 in HBM, add happens in f32 in-kernel, output cast to bf16.
    x_bf = x.astype(jnp.bfloat16)
    out_bf = jax.block_until_ready(positional_encoding_forward(x_bf, pe, min_pallas_bytes=0))
    ref_bf = (x_bf.astype(jnp.float32) + pe[:seq_len][:, None, :]).astype(jnp.bfloat16)
    assert out_bf.dtype == jnp.bfloat16
    assert jnp.allclose(out_bf.astype(jnp.float32), ref_bf.astype(jnp.float32),
                        atol=1e-2, rtol=1e-2)

    # Genuinely tiny shape (the original toy case): skips Pallas, XLA fuses the add.
    x_small = jax.random.normal(kt, (8, 2, 32), dtype=jnp.float32)
    pe_small = build_positional_encoding(32, max_len=64)
    out_small = jax.block_until_ready(positional_encoding_forward(x_small, pe_small))
    assert jnp.allclose(out_small, x_small + pe_small[:8][:, None, :], atol=1e-6, rtol=1e-6)

    print("KERNEL_OK")
</pallas_src>

<mosaic_0001>
module attributes {stable_mosaic.version = 11 : i64} {
  func.func @_pe_add_kernel(%arg0: i32, %arg1: memref<32x8x128xf32, #tpu.memory_space<vmem>>, %arg2: memref<32x128xf32, #tpu.memory_space<vmem>>, %arg3: memref<32x8x128xf32, #tpu.memory_space<vmem>>) attributes {dimension_semantics = [#tpu.dimension_semantics<parallel>], iteration_bounds = array<i64: 2>, scalar_prefetch = 0 : i64, scratch_operands = 0 : i64, tpu.core_type = #tpu.core_type<tc>, window_params = [{transform_indices = @transform_0, window_bounds = array<i64: 32, 8, 128>}, {transform_indices = @transform_1, window_bounds = array<i64: 32, 128>}, {transform_indices = @transform_2, window_bounds = array<i64: 32, 8, 128>}]} {
    %c0 = arith.constant 0 : index
    %c0_0 = arith.constant 0 : index
    %c0_1 = arith.constant 0 : index
    %0 = vector.load %arg1[%c0, %c0_0, %c0_1] : memref<32x8x128xf32, #tpu.memory_space<vmem>>, vector<32x8x128xf32>
    %c0_2 = arith.constant 0 : index
    %c0_3 = arith.constant 0 : index
    %1 = vector.load %arg2[%c0_2, %c0_3] : memref<32x128xf32, #tpu.memory_space<vmem>>, vector<32x128xf32>
    %2 = vector.shape_cast %1 : vector<32x128xf32> to vector<32x1x128xf32>
    %3 = vector.broadcast %2 : vector<32x1x128xf32> to vector<32x8x128xf32>
    %4 = arith.addf %0, %3 : vector<32x8x128xf32>
    %c0_4 = arith.constant 0 : index
    %c0_5 = arith.constant 0 : index
    %c0_6 = arith.constant 0 : index
    %5 = vector.load %arg3[%c0_4, %c0_5, %c0_6] : memref<32x8x128xf32, #tpu.memory_space<vmem>>, vector<32x8x128xf32>
    tpu.vector_store %arg3[%c0_4, %c0_5, %c0_6], %4 {strides = array<i32>} : memref<32x8x128xf32, #tpu.memory_space<vmem>>, vector<32x8x128xf32>,
    return
  }
  func.func @transform_0(%arg0: i32) -> (i32, i32, i32) {
    %c0_i32 = arith.constant 0 : i32
    %c0_i32_0 = arith.constant 0 : i32
    %c0_i32_1 = arith.constant 0 : i32
    return %arg0, %c0_i32, %c0_i32_0 : i32, i32, i32
  }
  func.func @transform_1(%arg0: i32) -> (i32, i32) {
    %c0_i32 = arith.constant 0 : i32
    %c0_i32_0 = arith.constant 0 : i32
    return %arg0, %c0_i32 : i32, i32
  }
  func.func @transform_2(%arg0: i32) -> (i32, i32, i32) {
    %c0_i32 = arith.constant 0 : i32
    %c0_i32_0 = arith.constant 0 : i32
    %c0_i32_1 = arith.constant 0 : i32
    return %arg0, %c0_i32, %c0_i32_0 : i32, i32, i32
  }
}

</mosaic_0001>

<bundles_post_ra>
// kernel: tpu_custom_call.1
= control target key start
LH: loop header
LB: loop body
LE: loop exit
PB: predicated region body
PF: predicated region fallthrough
CT: control target
= control target key end

     0   :  { %7 = vsyncpa [#allocation3], 0  ;;  %s1357_s0 = inlined_call_operand.hbm [shape: f32[64,8,128], index: 0, kind: input, shape index: {}]   ;;  %s1358_s1 = inlined_call_operand.hbm [shape: f32[256,128], index: 1, kind: input, shape index: {}]   ;;  %s1359_s2 = inlined_call_operand.hbm [shape: f32[64,8,128], index: 2, kind: output, shape index: {}]  }
   0x1   :  { %9 = vsyncpa [#allocation3 + $0x1], 0 }
   0x2   :  { %10 = vsyncpa [#allocation6], 0 }
   0x3   :  { %12 = vsyncpa [#allocation6 + $0x1], 0 }
   0x4   :  { %13 = vsyncpa [#allocation4], 0 }
   0x5   :  { %15 = vsyncpa [#allocation4 + $0x1], 0  ;;  %s1005_s9 = smov 0   ;;  %s1007_s10 = smov 0  }
   0x6   :  { %s1009_s11 = smov 0   ;;  %s1011_s12 = smov 0  }
   0x7 LB: > { %s1026_s13 = sadd.s32 4294967295, %s980_s12   ;;  %s775_s14 = sadd.s32 4294967294, %s980_s12   ;;  %s980_s12 = sphi %s1011_s12, %s1375_s12   ;;  %s976_s11 = sphi %s1009_s11, %s1374_s11   ;;  %s972_s10 = sphi %s1007_s10, %s1373_s10   ;;  %s968_s9 = sphi %s1005_s9, %s1372_s9  }
   0x8   : > { %s1030_s15 = sadd.s32 1, %s980_s12   ;;  %s28_s16 = sadd.s32 1, %s976_s11 }
   0x9   : > { %s25_s17 = ssub.s32 %s980_s12, %s1030_s15  ;;  %p35_p0 = scmp.ne.s32.totalorder %s976_s11, %s972_s10 }
   0xa   : > { %p26_p1 = scmp.eq.s32.totalorder %s25_s17, 0  ;;  %p36_p2 = scmp.eq.s32.totalorder %s980_s12, 0 }
   0xb   : > { %p41_p3 = scmp.ne.s32.totalorder %s972_s10, %s968_s9  ;;  %p42_p4 = scmp.eq.s32.totalorder %s1026_s13, 0 }
   0xc   : > { %s1042_s18 = scalar_select %p26_p1, %s976_s11, %s28_s16  }
   0xd   : > { %p1044_p5 = por %p36_p2, %p35_p0  ;;  %p1048_p6 = por %p42_p4, %p41_p3 }
   0xe   : > { %p91_p7 = scmp.eq.s32.totalorder %s1026_s13, 1  ;;  %p97_p8 = scmp.eq.s32.totalorder %s775_s14, 1 }
   0xf   : > { %s1363_s20 = scalar_select %p1048_p6, 1, 0 }
  0x10   : > { %p813_p10 = scmp.lt.s32.totalorder %s980_s12, 2  ;;  %p1055_p11 = por %p91_p7, %p35_p0 }
  0x11   : > { %p1059_p12 = por %p97_p8, %p41_p3  ;;  %s1064_s23 = sand.u32 1, %s976_s11  }
  0x12   : > { %s1364_s21 = scalar_select %p1055_p11, 1, 0 }
  0x13   : > { %s1365_s22 = scalar_select %p1059_p12, 1, 0 }
  0x14   : > { %s793_s24 = sshll.u32 %s980_s12, 12  ;;  %s778_s25 = sshll.u32 %s1064_s23, 8 }
  0x15   : > { %s1071_s28 = scalar_lea.hbm %s1357_s0, %s793_s24  ;;  %s121_s29 = scalar_lea.vmem [#allocation2], %s778_s25 }
  0x16   : > { %s128_s30 = sshll.u32 %s121_s29, 4  ;;  %p1075_p13 = pnand %p813_p10, %p1044_p5  ;;  %s1079_s30 = int_to_ptr.vmem [resolvable:$true] %s128_s30 }
  0x17   : > { %s118_s4 = scalar_lea.sflag [#allocation3], %s1064_s23  ;;  %s856_s5 = scalar_lea.hbm %s1071_s28, 4096 }
  0x18   : > { %p857_p0 = scmp.ne.s32.totalorder %s1071_s28, %s856_s5  ;;  %p858_p1 = pneg %p1075_p13 }
  0x19   : > { %s861_s8 = scalar_lea.hbm %s1357_s0, 8192  ;;  %p862_p4 = scmp.lt.s32.totalorder %s1071_s28, %s1357_s0 }
  0x1a   : > { %p859_p2 = pnand %p858_p1, %p857_p0  ;;  %p863_p5 = scmp.lt.s32.totalorder %s861_s8, %s856_s5 }
  0x1c   : > { %p860_p3 = pneg %p859_p2  ;;  %p864_p7 = por %p863_p5, %p862_p4 }
  0x1e   : > { %p865_p8 = pnand %p864_p7, %p860_p3 }
  0x20   : > { %868 = shalt.err (!%p865_p8)
}
  0x21   : > { %s869_s17 = scalar_lea.vmem %s1079_s30, 4096  ;;  %s982_s19 = smov [#allocation2]  }
  0x22   : > { %p870_p10 = scmp.ne.s32.totalorder %s1079_s30, %s869_s17  ;;  %s874_s24 = sshll.u32 %s982_s19, 4  ;;  %s875_s24 = int_to_ptr.vmem [resolvable:$false] %s874_s24 }
  0x23   : > { %s876_s25 = scalar_lea.vmem %s875_s24, 8192  ;;  %p877_p9 = scmp.lt.s32.totalorder %s1079_s30, %s875_s24 }
  0x24   : > { %p872_p0 = pnand %p870_p10, %p858_p1  ;;  %p878_p12 = scmp.lt.s32.totalorder %s876_s25, %s869_s17 }
  0x26   : > { %p873_p2 = pneg %p872_p0  ;;  %p879_p11 = por %p878_p12, %p877_p9 }
  0x28   : > { %p880_p4 = pnand %p879_p11, %p873_p2 }
  0x2a   : > { %883 = shalt.err (!%p880_p4)
}
  0x2b   : > { %s983_s26 = smov 128   ;;  %s984_s27 = smov 8  }
  0x2c   : > { %805 = dma.hbm_to_vmem [thread:$0]  (!%p1075_p13), %s1071_s28, 4096, %s1079_s30, %s118_s4, %s983_s26, %s983_s26, %s984_s27  }
  0x2d   : > { %p784_p9 = scmp.ge.s32.totalorder %s980_s12, 1  ;;  %p157_p11 = scmp.lt.s32.totalorder %s980_s12, 3 }
  0x2e   : > { %s781_s29 = sshll.u32 %s1064_s23, 5  ;;  %s794_s6 = sshll.u32 %s980_s12, 9 }
  0x2f   : > { %p1114_p12 = pnand %p784_p9, %p157_p11  ;;  %s142_s7 = scalar_lea.vmem [#allocation5], %s781_s29 }
  0x30   : > { %s149_s8 = sshll.u32 %s142_s7, 4  ;;  %s1122_s17 = scalar_lea.hbm %s1358_s1, %s794_s6  ;;  %s1124_s8 = int_to_ptr.vmem [resolvable:$true] %s149_s8 }
  0x31   : > { %s139_s28 = scalar_lea.sflag [#allocation6], %s1064_s23  ;;  %s884_s30 = scalar_lea.hbm %s1122_s17, 512 }
  0x32   : > { %p885_p3 = scmp.ne.s32.totalorder %s1122_s17, %s884_s30  ;;  %s889_s24 = scalar_lea.hbm %s1358_s1, 4096 }
  0x33   : > { %p890_p8 = scmp.lt.s32.totalorder %s1122_s17, %s1358_s1  ;;  %p891_p10 = scmp.lt.s32.totalorder %s889_s24, %s884_s30 }
  0x34   : > { %p887_p5 = pnand %p885_p3, %p858_p1 }
  0x35   : > { %p892_p0 = por %p891_p10, %p890_p8 }
  0x36   : > { %p888_p7 = pneg %p887_p5 }
  0x38   : > { %p893_p2 = pnand %p892_p0, %p888_p7 }
  0x3a   : > { %896 = shalt.err (!%p893_p2)
}
  0x3b   : > { %s897_s23 = scalar_lea.vmem %s1124_s8, 512  ;;  %s985_s6 = smov [#allocation5]  }
  0x3c   : > { %p898_p4 = scmp.ne.s32.totalorder %s1124_s8, %s897_s23  ;;  %s902_s7 = sshll.u32 %s985_s6, 4  ;;  %s903_s7 = int_to_ptr.vmem [resolvable:$false] %s902_s7 }
  0x3d   : > { %s904_s14 = scalar_lea.vmem %s903_s7, 1024  ;;  %p905_p3 = scmp.lt.s32.totalorder %s1124_s8, %s903_s7 }
  0x3e   : > { %p900_p9 = pnand %p898_p4, %p858_p1  ;;  %p906_p5 = scmp.lt.s32.totalorder %s904_s14, %s897_s23 }
  0x40   : > { %p901_p11 = pneg %p900_p9  ;;  %p907_p6 = por %p906_p5, %p905_p3 }
  0x42   : > { %p908_p8 = pnand %p907_p6, %p901_p11 }
  0x44   : > { %911 = shalt.err (!%p908_p8)
}
  0x45   : > { %808 = dma.hbm_to_vmem [thread:$0]  (!%p1075_p13), %s1122_s17, 512, %s1124_s8, %s139_s28, %s983_s26, %s983_s26, %s984_s27  }
  0x46   : > { %161 = sbr.rel (%p1114_p12) target bundleno = 137 (0x89), region = 28  ;;  %s1155_s16 = sand.u32 (!%p1114_p12), 1, %s972_s10  }
  0x47   : > { %s785_s30 = sshll.u32 (!%p1114_p12), %s1155_s16, 8  ;;  %s164_s4 = scalar_lea.sflag (!%p1114_p12), [#allocation3], %s1155_s16 }
  0x48   : > { %s1161_s3 = scalar_lea.vmem (!%p1114_p12), [#allocation2], %s785_s30  ;;  %p1368_p6 = scmp.ne.s32.totalorder (!%p1114_p12), %s1363_s20, 0 }
  0x4b   : > { %955 = dma.done.wait (%p1368_p6), %s164_s4, 4096  }
  0x4c   : > { %957 = vsyncadd (%p1368_p6), %s164_s4, 4294963200  ;;  %s786_s26 = sshll.u32 %s1155_s16, 5  ;;  %s173_s27 = scalar_lea.sflag [#allocation6], %s1155_s16 }
  0x4d   : > { %s1169_s5 = scalar_lea.vmem [#allocation5], %s786_s26 }
  0x4e   : > { %959 = dma.done.wait (%p1368_p6), %s173_s27, 512  }
  0x4f   : > { %961 = vsyncadd (%p1368_p6), %s173_s27, 4294966784  ;;  %v249_v0 = vlaneseq  ;;  %v986_v1 = vmov 1966171168   ;;  %v237_v6 = vld [vmem:[%s1169_s5] sm:$0xff]  ;;  %v238_v13 = vld [vmem:[%s1169_s5 + $0x8] sm:$0xff]  ;;  %s1203_s20 = scalar_lea.vmem [#allocation7], %s785_s30 }
  0x50   : > { %v247_v2 = vunpack.c.l.s4 %v986_v1  ;;  %v245_v9 = vcombine.high %v237_v6, %v237_v6  ;;  %v205_v14 = vld [vmem:[%s1161_s3] sm:$0xff]  ;;  %v294_v16 = vcombine.high %v238_v13, %v238_v13  ;;  %v206_v21 = vld [vmem:[%s1161_s3 + $0x8] sm:$0xff]  ;;  %v207_v22 = vld [vmem:[%s1161_s3 + $0x10] sm:$0xff]  ;;  %s795_s8 = sshll.u32 %s1026_s13, 12  ;;  %s679_s17 = sshll.u32 %s1203_s20, 4  ;;  %s1311_s17 = int_to_ptr.vmem [resolvable:$true] %s679_s17 }
  0x51   : > { %v250_v3 = vshrl.u32 %v249_v0, 7  ;;  %v209_v31 = vld [vmem:[%s1161_s3 + $0x20] sm:$0xff]  ;;  %v208_v32 = vld [vmem:[%s1161_s3 + $0x18] sm:$0xff]  ;;  %v210_v41 = vld [vmem:[%s1161_s3 + $0x28] sm:$0xff]  ;;  %s1309_s24 = scalar_lea.hbm %s1359_s2, %s795_s8  ;;  %s666_s13 = scalar_lea.sflag [#allocation4], %s1155_s16 }
  0x52   : > { %v248_v4 = vunpack.c.0.s8 %v247_v2  ;;  %v213_v36 = vld [vmem:[%s1161_s3 + $0x40] sm:$0xff]  ;;  %v211_v42 = vld [vmem:[%s1161_s3 + $0x30] sm:$0xff]  ;;  %v214_v48 = vld [vmem:[%s1161_s3 + $0x48] sm:$0xff]  ;;  %s912_s25 = scalar_lea.vmem %s1311_s17, 4096  ;;  %p1369_p1 = scmp.ne.s32.totalorder %s1364_s21, 0 }
  0x53   : > { %v1179_v8 = vsub.s32 0, %v250_v3  ;;  %v212_v50 = vld [vmem:[%s1161_s3 + $0x38] sm:$0xff]  ;;  %v239_v54 = vld [vmem:[%s1169_s5 + $0x10] sm:$0xff]  ;;  %p913_p13 = scmp.ne.s32.totalorder %s1311_s17, %s912_s25  ;;  %s987_s29 = smov [#allocation7]  }
  0x54   : > { %v1175_v5 = vsub.s32 %v248_v4, %v250_v3  ;;  %v215_v58 = vld [vmem:[%s1161_s3 + $0x50] sm:$0xff]  ;;  %v216_v62 = vld [vmem:[%s1161_s3 + $0x58] sm:$0xff]  ;;  %v217_v3 = vld [vmem:[%s1161_s3 + $0x60] sm:$0xff]  ;;  %s916_s23 = sshll.u32 %s987_s29, 4  ;;  %s917_s23 = int_to_ptr.vmem [resolvable:$false] %s916_s23 }
  0x55   : > { %p914_p12 = pnand %p913_p13, %p1369_p1  ;;  %s918_s6 = scalar_lea.vmem %s917_s23, 8192 }
  0x56   : > { %v252_v7 = vrot.slane %v237_v6, %v1175_v5  ;;  %v259_v12 = vrot.slane %v245_v9, %v1175_v5  ;;  %v301_v15 = vrot.slane %v238_v13, %v1175_v5  ;;  %v308_v26 = vrot.slane %v294_v16, %v1175_v5  ;;  %v218_v13 = vld [vmem:[%s1161_s3 + $0x68] sm:$0xff]  ;;  %p919_p10 = scmp.lt.s32.totalorder %s1311_s17, %s917_s23  ;;  %p920_p0 = scmp.lt.s32.totalorder %s918_s6, %s912_s25 }
  0x57   : > { %v350_v4 = vrot.slane %v239_v54, %v1175_v5  ;;  %v343_v6 = vcombine.high %v239_v54, %v239_v54  ;;  %p915_p7 = pneg %p914_p12 }
  0x58   : > { %v268_v10 = vrot.slane %v252_v7, %v1175_v5  ;;  %v260_v11 = vcombine.high %v252_v7, %v252_v7  ;;  %v275_v20 = vrot.slane %v259_v12, %v1175_v5  ;;  %v261_v23 = vcombine.high %v259_v12, %v259_v12  ;;  %p921_p2 = por %p920_p0, %p919_p10 }
  0x59   : > { %v317_v24 = vrot.slane %v301_v15, %v1175_v5  ;;  %v309_v25 = vcombine.high %v301_v15, %v301_v15  ;;  %v324_v63 = vrot.slane %v308_v26, %v1175_v5  ;;  %v310_v0 = vcombine.high %v308_v26, %v308_v26 }
  0x5a   : > { %v444_v17 = vrot.slane %v268_v10, %v1179_v8  ;;  %v282_v18 = vrot.slane %v260_v11, %v1175_v5  ;;  %v290_v19 = vcombine.high %v268_v10, %v268_v10  ;;  %v460_v33 = vrot.slane %v275_v20, %v1179_v8  ;;  %p922_p4 = pnand %p921_p2, %p915_p7 }
  0x5b   : > { %v289_v34 = vrot.slane %v261_v23, %v1175_v5  ;;  %v291_v35 = vcombine.high %v275_v20, %v275_v20  ;;  %v476_v37 = vrot.slane %v317_v24, %v1179_v8  ;;  %v331_v43 = vrot.slane %v309_v25, %v1175_v5  ;;  %v220_v23 = vld [vmem:[%s1161_s3 + $0x78] sm:$0xff] }
  0x5c   : > { %v601_v27 = vadd.f32 %v444_v17, %v205_v14  ;;  %v448_v28 = vrot.slane %v282_v18, %v1179_v8  ;;  %v452_v29 = vrot.slane %v290_v19, %v1179_v8  ;;  %v292_v30 = vcombine.high %v282_v18, %v282_v18  ;;  %v219_v14 = vld [vmem:[%s1161_s3 + $0x70] sm:$0xff] }
  0x5d   : > { %v605_v44 = vadd.f32 %v460_v33, %v209_v31  ;;  %v464_v45 = vrot.slane %v289_v34, %v1179_v8  ;;  %v468_v46 = vrot.slane %v291_v35, %v1179_v8  ;;  %v293_v47 = vcombine.high %v289_v34, %v289_v34  ;;  %v222_v31 = vld [vmem:[%s1161_s3 + $0x88] sm:$0xff] }
  0x5e   : > { %633 = vst [vmem:[%s1203_s20] sm:$0xff] %v601_v27  ;;  %v602_v38 = vadd.f32 %v448_v28, %v206_v21  ;;  %v603_v39 = vadd.f32 %v452_v29, %v207_v22  ;;  %v456_v40 = vrot.slane %v292_v30, %v1179_v8  ;;  %v609_v51 = vadd.f32 %v476_v37, %v213_v36  ;;  %v221_v22 = vld [vmem:[%s1161_s3 + $0x80] sm:$0xff] }
  0x5f   : > { %v480_v52 = vrot.slane %v331_v43, %v1179_v8  ;;  %v339_v53 = vcombine.high %v317_v24, %v317_v24  ;;  %637 = vst [vmem:[%s1203_s20 + $0x20] sm:$0xff] %v605_v44  ;;  %v606_v55 = vadd.f32 %v464_v45, %v210_v41  ;;  %v607_v56 = vadd.f32 %v468_v46, %v211_v42  ;;  %v240_v44 = vld [vmem:[%s1169_s5 + $0x18] sm:$0xff] }
  0x60   : > { %634 = vst [vmem:[%s1203_s20 + $0x8] sm:$0xff] %v602_v38  ;;  %635 = vst [vmem:[%s1203_s20 + $0x10] sm:$0xff] %v603_v39  ;;  %v604_v49 = vadd.f32 %v456_v40, %v208_v32  ;;  %v472_v57 = vrot.slane %v293_v47, %v1179_v8  ;;  %v341_v59 = vcombine.high %v331_v43, %v331_v43  ;;  %v223_v32 = vld [vmem:[%s1161_s3 + $0x90] sm:$0xff]  ;;  %v225_v38 = vld [vmem:[%s1161_s3 + $0xa0] sm:$0xff] }
  0x61   : > { %641 = vst [vmem:[%s1203_s20 + $0x40] sm:$0xff] %v609_v51  ;;  %v610_v60 = vadd.f32 %v480_v52, %v214_v48  ;;  %v484_v61 = vrot.slane %v339_v53, %v1179_v8  ;;  %638 = vst [vmem:[%s1203_s20 + $0x28] sm:$0xff] %v606_v55  ;;  %v492_v9 = vrot.slane %v324_v63, %v1179_v8  ;;  %v224_v40 = vld [vmem:[%s1161_s3 + $0x98] sm:$0xff]  ;;  %v226_v48 = vld [vmem:[%s1161_s3 + $0xa8] sm:$0xff] }
  0x62   : > { %636 = vst [vmem:[%s1203_s20 + $0x18] sm:$0xff] %v604_v49  ;;  %639 = vst [vmem:[%s1203_s20 + $0x30] sm:$0xff] %v607_v56  ;;  %v608_v1 = vadd.f32 %v472_v57, %v212_v50  ;;  %v488_v2 = vrot.slane %v341_v59, %v1179_v8  ;;  %v338_v10 = vrot.slane %v310_v0, %v1175_v5  ;;  %v227_v49 = vld [vmem:[%s1161_s3 + $0xb0] sm:$0xff]  ;;  %v228_v56 = vld [vmem:[%s1161_s3 + $0xb8] sm:$0xff] }
  0x63   : > { %642 = vst [vmem:[%s1203_s20 + $0x48] sm:$0xff] %v610_v60  ;;  %v611_v7 = vadd.f32 %v484_v61, %v215_v58  ;;  %v340_v11 = vcombine.high %v324_v63, %v324_v63  ;;  %v366_v15 = vrot.slane %v350_v4, %v1175_v5  ;;  %v358_v16 = vcombine.high %v350_v4, %v350_v4  ;;  %v229_v63 = vld [vmem:[%s1161_s3 + $0xc0] sm:$0xff] }
  0x64   : > { %640 = vst [vmem:[%s1203_s20 + $0x38] sm:$0xff] %v608_v1  ;;  %v612_v12 = vadd.f32 %v488_v2, %v216_v62  ;;  %v357_v17 = vrot.slane %v343_v6, %v1175_v5  ;;  %v613_v18 = vadd.f32 %v492_v9, %v217_v3  ;;  %v496_v19 = vrot.slane %v338_v10, %v1179_v8  ;;  %v230_v6 = vld [vmem:[%s1161_s3 + $0xc8] sm:$0xff] }
  0x65   : > { %643 = vst [vmem:[%s1203_s20 + $0x50] sm:$0xff] %v611_v7  ;;  %v500_v20 = vrot.slane %v340_v11, %v1179_v8  ;;  %v342_v21 = vcombine.high %v338_v10, %v338_v10  ;;  %v508_v24 = vrot.slane %v366_v15, %v1179_v8  ;;  %v380_v25 = vrot.slane %v358_v16, %v1175_v5  ;;  %v231_v7 = vld [vmem:[%s1161_s3 + $0xd0] sm:$0xff] }
  0x66   : > { %644 = vst [vmem:[%s1203_s20 + $0x58] sm:$0xff] %v612_v12  ;;  %v388_v26 = vcombine.high %v366_v15, %v366_v15  ;;  %v373_v27 = vrot.slane %v357_v17, %v1175_v5  ;;  %645 = vst [vmem:[%s1203_s20 + $0x60] sm:$0xff] %v613_v18  ;;  %v614_v28 = vadd.f32 %v496_v19, %v218_v13  ;;  %v232_v13 = vld [vmem:[%s1161_s3 + $0xd8] sm:$0xff]  ;;  %v233_v19 = vld [vmem:[%s1161_s3 + $0xe0] sm:$0xff] }
  0x67   : > { %v615_v29 = vadd.f32 %v500_v20, %v219_v14  ;;  %v504_v30 = vrot.slane %v342_v21, %v1179_v8  ;;  %v359_v33 = vcombine.high %v357_v17, %v357_v17  ;;  %v617_v34 = vadd.f32 %v508_v24, %v221_v22  ;;  %v234_v24 = vld [vmem:[%s1161_s3 + $0xe8] sm:$0xff] }
  0x68   : > { %v512_v35 = vrot.slane %v380_v25, %v1179_v8  ;;  %v516_v36 = vrot.slane %v388_v26, %v1179_v8  ;;  %v390_v37 = vcombine.high %v380_v25, %v380_v25  ;;  %646 = vst [vmem:[%s1203_s20 + $0x68] sm:$0xff] %v614_v28  ;;  %v524_v41 = vrot.slane %v373_v27, %v1179_v8  ;;  %v235_v25 = vld [vmem:[%s1161_s3 + $0xf0] sm:$0xff] }
  0x69   : > { %647 = vst [vmem:[%s1203_s20 + $0x70] sm:$0xff] %v615_v29  ;;  %v616_v39 = vadd.f32 %v504_v30, %v220_v23  ;;  %v387_v42 = vrot.slane %v359_v33, %v1175_v5  ;;  %v389_v43 = vcombine.high %v373_v27, %v373_v27  ;;  %649 = vst [vmem:[%s1203_s20 + $0x80] sm:$0xff] %v617_v34 }
  0x6a   : > { %v618_v45 = vadd.f32 %v512_v35, %v222_v31  ;;  %v619_v46 = vadd.f32 %v516_v36, %v223_v32  ;;  %v520_v47 = vrot.slane %v390_v37, %v1179_v8  ;;  %v399_v50 = vrot.slane %v240_v44, %v1175_v5 }
  0x6b   : > { %648 = vst [vmem:[%s1203_s20 + $0x78] sm:$0xff] %v616_v39  ;;  %v621_v51 = vadd.f32 %v524_v41, %v225_v38  ;;  %v528_v52 = vrot.slane %v387_v42, %v1179_v8  ;;  %v532_v53 = vrot.slane %v389_v43, %v1179_v8  ;;  %v391_v54 = vcombine.high %v387_v42, %v387_v42 }
  0x6c   : > { %650 = vst [vmem:[%s1203_s20 + $0x88] sm:$0xff] %v618_v45  ;;  %651 = vst [vmem:[%s1203_s20 + $0x90] sm:$0xff] %v619_v46  ;;  %v620_v55 = vadd.f32 %v520_v47, %v224_v40  ;;  %v415_v57 = vrot.slane %v399_v50, %v1175_v5  ;;  %v407_v58 = vcombine.high %v399_v50, %v399_v50 }
  0x6d   : > { %v392_v59 = vcombine.high %v240_v44, %v240_v44  ;;  %653 = vst [vmem:[%s1203_s20 + $0xa0] sm:$0xff] %v621_v51  ;;  %v622_v60 = vadd.f32 %v528_v52, %v226_v48  ;;  %v623_v61 = vadd.f32 %v532_v53, %v227_v49  ;;  %v536_v62 = vrot.slane %v391_v54, %v1179_v8 }
  0x6e   : > { %652 = vst [vmem:[%s1203_s20 + $0x98] sm:$0xff] %v620_v55  ;;  %v540_v0 = vrot.slane %v415_v57, %v1179_v8  ;;  %v429_v1 = vrot.slane %v407_v58, %v1175_v5  ;;  %v437_v2 = vcombine.high %v415_v57, %v415_v57 }
  0x6f   : > { %v406_v3 = vrot.slane %v392_v59, %v1175_v5  ;;  %654 = vst [vmem:[%s1203_s20 + $0xa8] sm:$0xff] %v622_v60  ;;  %655 = vst [vmem:[%s1203_s20 + $0xb0] sm:$0xff] %v623_v61  ;;  %v624_v4 = vadd.f32 %v536_v62, %v228_v56 }
  0x70   : > { %v625_v9 = vadd.f32 %v540_v0, %v229_v63  ;;  %v544_v10 = vrot.slane %v429_v1, %v1179_v8  ;;  %v548_v11 = vrot.slane %v437_v2, %v1179_v8  ;;  %v439_v12 = vcombine.high %v429_v1, %v429_v1 }
  0x71   : > { %656 = vst [vmem:[%s1203_s20 + $0xb8] sm:$0xff] %v624_v4  ;;  %v422_v14 = vrot.slane %v406_v3, %v1175_v5  ;;  %v408_v15 = vcombine.high %v406_v3, %v406_v3 }
  0x72   : > { %657 = vst [vmem:[%s1203_s20 + $0xc0] sm:$0xff] %v625_v9  ;;  %v626_v16 = vadd.f32 %v544_v10, %v230_v6  ;;  %v627_v17 = vadd.f32 %v548_v11, %v231_v7  ;;  %v552_v18 = vrot.slane %v439_v12, %v1179_v8 }
  0x73   : > { %v556_v20 = vrot.slane %v422_v14, %v1179_v8  ;;  %v436_v21 = vrot.slane %v408_v15, %v1175_v5  ;;  %v438_v22 = vcombine.high %v422_v14, %v422_v14  ;;  %v236_v5 = vld [vmem:[%s1161_s3 + $0xf8] sm:$0xff] }
  0x74   : > { %658 = vst [vmem:[%s1203_s20 + $0xc8] sm:$0xff] %v626_v16  ;;  %659 = vst [vmem:[%s1203_s20 + $0xd0] sm:$0xff] %v627_v17  ;;  %v628_v23 = vadd.f32 %v552_v18, %v232_v13 }
  0x75   : > { %v629_v26 = vadd.f32 %v556_v20, %v233_v19  ;;  %v560_v27 = vrot.slane %v436_v21, %v1179_v8  ;;  %v564_v28 = vrot.slane %v438_v22, %v1179_v8  ;;  %v440_v29 = vcombine.high %v436_v21, %v436_v21 }
  0x76   : > { %660 = vst [vmem:[%s1203_s20 + $0xd8] sm:$0xff] %v628_v23 }
  0x77   : > { %661 = vst [vmem:[%s1203_s20 + $0xe0] sm:$0xff] %v629_v26  ;;  %v630_v30 = vadd.f32 %v560_v27, %v234_v24  ;;  %v631_v31 = vadd.f32 %v564_v28, %v235_v25  ;;  %v568_v32 = vrot.slane %v440_v29, %v1179_v8 }
  0x79   : > { %662 = vst [vmem:[%s1203_s20 + $0xe8] sm:$0xff] %v630_v30  ;;  %663 = vst [vmem:[%s1203_s20 + $0xf0] sm:$0xff] %v631_v31  ;;  %v632_v33 = vadd.f32 %v568_v32, %v236_v5 }
  0x7b   : > { %664 = vst [vmem:[%s1203_s20 + $0xf8] sm:$0xff] %v632_v33 }
  0x7c   : > { %925 = shalt.err (!%p922_p4)
}
  0x7d   : > { %s926_s7 = scalar_lea.hbm %s1309_s24, 4096  ;;  %s930_s4 = scalar_lea.hbm %s1359_s2, 8192 }
  0x7e   : > { %p927_p9 = scmp.ne.s32.totalorder %s1309_s24, %s926_s7  ;;  %p931_p5 = scmp.lt.s32.totalorder %s1309_s24, %s1359_s2 }
  0x7f   : > { %p932_p8 = scmp.lt.s32.totalorder %s930_s4, %s926_s7 }
  0x80   : > { %p928_p11 = pnand %p927_p9, %p1369_p1 }
  0x81   : > { %p933_p6 = por %p932_p8, %p931_p5 }
  0x82   : > { %p929_p3 = pneg %p928_p11 }
  0x84   : > { %p934_p13 = pnand %p933_p6, %p929_p3 }
  0x86   : > { %937 = shalt.err (!%p934_p13)
}
  0x87   : > { %s988_s27 = smov 128   ;;  %s989_s5 = smov 8  }
  0x88   : > { %800 = dma.vmem_to_hbm [thread:$0]  (%p1369_p1), %s1311_s17, 4096, %s1309_s24, %s666_s13, %s988_s27, %s988_s27, %s989_s5  }
  0x89 PF: > { %s694_s20 = sand.u32 1, %s968_s9   ;;  %p1370_p12 = scmp.ne.s32.totalorder %s1365_s22, 0 }
  0x8a   : > { %p1371_p7 = scmp.ge.s32.totalorder %s980_s12, 2  ;;  %s695_s8 = scalar_lea.sflag [#allocation4], %s694_s20 }
  0x8c   : > { %p810_p10 = pnand %p1371_p7, %p1370_p12 }
  0x8e   : > { %p811_p0 = pneg %p810_p10 }
  0x90   : > { %963 = dma.done.wait (%p811_p0), %s695_s8, 4096  }
  0x91   : > { %965 = vsyncadd (%p811_p0), %s695_s8, 4294963200  ;;  %p18_p2 = scmp.ge.s32.totalorder %s1030_s15, 4   ;;  %s1372_s9 = smov %s972_s10 }
  0x92   : > { %s1373_s10 = smov %s976_s11  ;;  %s1374_s11 = smov %s1042_s18 }
  0x93   : > { %s1375_s12 = smov %s1030_s15  ;;  %20 = sbr.rel (!%p18_p2) target bundleno = 7 (0x7), region = 86 }
  0x98   :  { %700 = vsyncpa [#allocation3], 1 }
  0x99   :  { %702 = vsyncpa [#allocation3 + $0x1], 1 }
  0x9a   :  { %703 = vsyncpa [#allocation6], 1 }
  0x9b   :  { %705 = vsyncpa [#allocation6 + $0x1], 1 }
  0x9c   :  { %706 = vsyncpa [#allocation4], 1 }
  0x9d   :  { %708 = vsyncpa [#allocation4 + $0x1], 1 }

</bundles_post_ra>
